<compile_context>
chip_gen: v7x
topology: tpu7x:2x2x1
jax: 0.10.0
libtpu: 0.0.40
codegen_flags: <defaults>
</compile_context>

<pallas_src>
import functools
import types

import numpy as np
import jax
import jax.numpy as jnp
from jax.experimental import pallas as pl
from jax.experimental.pallas import tpu as pltpu


def _round_up(n, m):
    return ((n + m - 1) // m) * m


def make_coup_policy(obs_size, action_size, hidden_size, lstm_size):
    """Factory: all static layout info is closed over so jitted wrappers only see arrays."""
    H, L, A = hidden_size, lstm_size, action_size
    assert H % 2 == 0, "hidden_size must be even"
    assert L % 16 == 0, "lstm_size should be a multiple of 16 for clean bf16 tiling"
    Hh = H // 2

    # ---- padded / fused widths (lanes multiples of 128) ----
    OBSP = _round_up(obs_size, 128)          # input-layer K (x lane pad)
    HP = _round_up(H, 128)                   # input-layer N (extra lanes stay exactly 0)
    G4 = 4 * L                               # fused LSTM gate width (i|f|g|o)
    G4P = _round_up(G4, 128)
    GK = HP + L                              # fused gate K: [h1 | h_prev]
    N1 = 2 * H + Hh                          # head 1: [policy1 | value1 | bluff1]
    N1P = _round_up(N1, 128)
    N2P = _round_up(3 * Hh, 128)             # head 2: block-diag(policy2, value2, I)
    N3P = _round_up(A + 2, 128)              # head 3: [logits | value | bluff_pre]
    WL = max(HP, G4P, N1P, N2P, N3P)         # packed slab lane width

    # ---- static row offsets into the packed bf16 weight slab (multiples of 16) ----
    R_IN = 0
    R_G = _round_up(R_IN + OBSP, 16)
    R_H1 = _round_up(R_G + GK, 16)
    R_H2 = _round_up(R_H1 + L, 16)
    R_H3 = _round_up(R_H2 + N1P, 16)
    W_ROWS = _round_up(R_H3 + N2P, 16)

    # ---- packed output / recurrent-state slab layout ----
    HOFF = A + 2                             # logits(A) | value | bluff | h(L) | c(L) | 0..
    COFF = HOFF + L
    USED = COFF + L
    SLAB_W = _round_up(max(USED, 128), 128)

    meta = types.SimpleNamespace(A=A, L=L, H=H, Hh=Hh, hoff=HOFF, coff=COFF,
                                 used=USED, slab_w=SLAB_W)

    # ------------------------------------------------------------------ kernel ----
    def _kernel(x_ref, state_ref, w_ref, b_ref, out_ref, h_sc, c_sc):
        f32, bf16 = jnp.float32, jnp.bfloat16
        dot = functools.partial(jnp.dot, preferred_element_type=f32)
        T, B = x_ref.shape[0], x_ref.shape[1]

        # recurrent state carried across the T-step loop in f32 VMEM scratch
        h_sc[...] = state_ref[:, HOFF:COFF]
        c_sc[...] = state_ref[:, COFF:USED]
        pad_tail = jnp.zeros((B, SLAB_W - USED), f32)   # hoisted out of the loop

        @pl.loop(0, T)
        def _(t):
            x = x_ref[t]                                                 # [B, OBSP] bf16
            # input layer + ReLU
            h1 = jnp.maximum(
                dot(x, w_ref[R_IN:R_IN + OBSP, 0:HP]) + b_ref[0:1, 0:HP], 0.0)
            # single fused LSTM gate matmul: [h1 | h_prev] @ [w_ih ; w_hh]  (i|f|g|o)
            z = jnp.concatenate(
                [h1.astype(bf16), h_sc[...].astype(bf16)], axis=-1)      # [B, HP+L]
            g = dot(z, w_ref[R_G:R_G + GK, 0:G4]) + b_ref[1:2, 0:G4]
            sig = jax.nn.sigmoid(g)          # whole-vreg EUP pass
            tan = jnp.tanh(g)                # whole-vreg EUP pass
            i_t = sig[:, 0:L]
            f_t = sig[:, L:2 * L]
            o_t = sig[:, 3 * L:4 * L]
            g_t = tan[:, 2 * L:3 * L]
            c_new = f_t * c_sc[...] + i_t * g_t
            h_new = o_t * jnp.tanh(c_new)
            # fused heads (policy / value / bluff together): 3 matmuls
            hb = h_new.astype(bf16)
            head1 = jnp.maximum(
                dot(hb, w_ref[R_H1:R_H1 + L, 0:N1P]) + b_ref[2:3, 0:N1P], 0.0)
            head2 = jnp.maximum(
                dot(head1.astype(bf16), w_ref[R_H2:R_H2 + N1P, 0:N2P])
                + b_ref[3:4, 0:N2P], 0.0)
            out3 = (dot(head2.astype(bf16), w_ref[R_H3:R_H3 + N2P, 0:N3P])
                    + b_ref[4:5, 0:N3P])
            # single dense lane-packed store of this step's outputs + new state
            slab = jnp.concatenate(
                [out3[:, 0:A + 1],                        # logits | value
                 jax.nn.sigmoid(out3[:, A + 1:A + 2]),    # bluff probability
                 h_new, c_new, pad_tail], axis=-1)
            out_ref[t] = slab
            h_sc[...] = h_new
            c_sc[...] = c_new

    def _call_kernel(params, xs, state):
        # xs: [T, B, obs] float; state: [Bp, SLAB_W] f32 packed
        T, B = xs.shape[0], xs.shape[1]
        Bp = state.shape[0]
        xp = jnp.pad(xs.astype(jnp.bfloat16),
                     ((0, 0), (0, Bp - B), (0, OBSP - obs_size)))
        vmem = pl.BlockSpec(memory_space=pltpu.MemorySpace.VMEM)
        return pl.pallas_call(
            _kernel,
            out_shape=jax.ShapeDtypeStruct((T, Bp, SLAB_W), jnp.float32),
            in_specs=[vmem, vmem, vmem, vmem],
            out_specs=vmem,
            scratch_shapes=[pltpu.VMEM((Bp, L), jnp.float32),
                            pltpu.VMEM((Bp, L), jnp.float32)],
        )(xp, state, params["w"], params["b"])

    # ------------------------------------------------------------------ params ----
    def init_params(key, dtype=jnp.bfloat16):
        """Mirrors CoupPolicyNetwork._init_weights (orthogonal gain sqrt(2) for Linear,
        gain 1 for LSTM, zero biases), packed into the fused slab layout."""
        f32 = jnp.float32
        orth2 = jax.nn.initializers.orthogonal(scale=float(np.sqrt(2.0)))
        orth1 = jax.nn.initializers.orthogonal(scale=1.0)
        ks = jax.random.split(key, 11)

        def lin_w(k, out_f, in_f):
            # PyTorch nn.Linear weight is (out, in); store transposed as (in, out).
            return np.asarray(orth2(k, (out_f, in_f), f32).T)

        w_in = lin_w(ks[0], H, obs_size)                       # (obs, H)
        w_ih = np.asarray(orth1(ks[1], (4 * L, H), f32).T)     # (H, 4L) i|f|g|o
        w_hh = np.asarray(orth1(ks[2], (4 * L, L), f32).T)     # (L, 4L)
        wp1 = lin_w(ks[3], H, L);  wp2 = lin_w(ks[4], Hh, H);  wp3 = lin_w(ks[5], A, Hh)
        wv1 = lin_w(ks[6], H, L);  wv2 = lin_w(ks[7], Hh, H);  wv3 = lin_w(ks[8], 1, Hh)
        wb1 = lin_w(ks[9], Hh, L); wb2 = lin_w(ks[10], 1, Hh)

        w = np.zeros((W_ROWS, WL), np.float32)
        # input layer
        w[0:obs_size, 0:H] = w_in
        # fused LSTM gates: rows 0:H = w_ih, rows HP:HP+L = w_hh (columns 0:4L)
        w[R_G:R_G + H, 0:G4] = w_ih
        w[R_G + HP:R_G + HP + L, 0:G4] = w_hh
        # head layer 1: [policy1 | value1 | bluff1]
        w[R_H1:R_H1 + L, 0:H] = wp1
        w[R_H1:R_H1 + L, H:2 * H] = wv1
        w[R_H1:R_H1 + L, 2 * H:2 * H + Hh] = wb1
        # head layer 2: block-diag(policy2, value2, I) -- bluff passes through (ReLU idempotent)
        w[R_H2:R_H2 + H, 0:Hh] = wp2
        w[R_H2 + H:R_H2 + 2 * H, Hh:2 * Hh] = wv2
        w[R_H2 + 2 * H:R_H2 + 2 * H + Hh, 2 * Hh:3 * Hh] = np.eye(Hh, dtype=np.float32)
        # head layer 3: block-diag(policy3, value3, bluff2)
        w[R_H3:R_H3 + Hh, 0:A] = wp3
        w[R_H3 + Hh:R_H3 + 2 * Hh, A:A + 1] = wv3
        w[R_H3 + 2 * Hh:R_H3 + 3 * Hh, A + 1:A + 2] = wb2

        # All biases are zero in the PyTorch init.  Row layout:
        #   0: input layer, 1: LSTM (bias_ih+bias_hh), 2: head1, 3: head2, 4: head3.
        b = np.zeros((8, WL), np.float32)

        return dict(w=jnp.asarray(w, dtype), b=jnp.asarray(b, jnp.float32))

    # ------------------------------------------------------------------ wrappers ----
    @jax.jit
    def forward(params, x, hidden=None):
        """Single-step equivalent of CoupPolicyNetwork.forward (thin T=1 wrapper)."""
        B = x.shape[0]
        Bp = max(8, _round_up(B, 8))
        state = jnp.zeros((Bp, SLAB_W), jnp.float32)
        if hidden is not None:
            h0 = hidden[0].reshape(B, L).astype(jnp.float32)
            c0 = hidden[1].reshape(B, L).astype(jnp.float32)
            state = state.at[:B, HOFF:COFF].set(h0)
            state = state.at[:B, COFF:USED].set(c0)
        out = _call_kernel(params, x[None], state)[0]
        logits = out[:B, 0:A]
        value = out[:B, A:A + 1]
        bluff = out[:B, A + 1:A + 2]
        h_new = out[:B, HOFF:COFF].reshape(1, B, L)
        c_new = out[:B, COFF:USED].reshape(1, B, L)
        return logits, value, bluff, (h_new, c_new)

    @jax.jit
    def rollout(params, xs, state_slab=None):
        """Multi-step forward over xs [T, B, obs]; weights DMA'd once for all T steps.
        Returns per-step (logits, values, bluffs) and the packed last-step slab, which
        can be passed straight back as `state_slab` for the next rollout."""
        T, B = xs.shape[0], xs.shape[1]
        Bp = max(8, _round_up(B, 8))
        if state_slab is None:
            state_slab = jnp.zeros((Bp, SLAB_W), jnp.float32)
        assert state_slab.shape == (Bp, SLAB_W)
        out = _call_kernel(params, xs, state_slab)
        logits = out[:, :B, 0:A]
        values = out[:, :B, A:A + 1]
        bluffs = out[:, :B, A + 1:A + 2]
        new_state = out[T - 1]          # packed [Bp, SLAB_W]; h at HOFF:COFF, c at COFF:USED
        return logits, values, bluffs, new_state

    # ------------------------------------------------------------------ reference ----
    def reference_forward(params, x, hidden=None):
        """Pure-JAX reference mirroring the ORIGINAL (unfused) PyTorch forward with the
        same bf16-in / f32-accumulate numerics; un-packs the slab so it also validates
        the gate / head fusion and the padding."""
        f32, bf16 = jnp.float32, jnp.bfloat16
        dot = functools.partial(jnp.dot, preferred_element_type=f32)
        w, b = params["w"].astype(bf16), params["b"]
        B = x.shape[0]

        w_in = w[0:obs_size, 0:H]
        w_ih = w[R_G:R_G + H, 0:4 * L]
        w_hh = w[R_G + HP:R_G + HP + L, 0:4 * L]
        wp1 = w[R_H1:R_H1 + L, 0:H]
        wv1 = w[R_H1:R_H1 + L, H:2 * H]
        wb1 = w[R_H1:R_H1 + L, 2 * H:2 * H + Hh]
        wp2 = w[R_H2:R_H2 + H, 0:Hh]
        wv2 = w[R_H2 + H:R_H2 + 2 * H, Hh:2 * Hh]
        wp3 = w[R_H3:R_H3 + Hh, 0:A]
        wv3 = w[R_H3 + Hh:R_H3 + 2 * Hh, A:A + 1]
        wb2 = w[R_H3 + 2 * Hh:R_H3 + 3 * Hh, A + 1:A + 2]

        if hidden is None:
            h0 = jnp.zeros((B, L), f32); c0 = jnp.zeros((B, L), f32)
        else:
            h0 = hidden[0].reshape(B, L).astype(f32)
            c0 = hidden[1].reshape(B, L).astype(f32)

        h1 = jax.nn.relu(dot(x.astype(bf16), w_in) + b[0:1, 0:H])
        g = dot(h1.astype(bf16), w_ih) + dot(h0.astype(bf16), w_hh) + b[1:2, 0:4 * L]
        i_t = jax.nn.sigmoid(g[:, 0:L])
        f_t = jax.nn.sigmoid(g[:, L:2 * L])
        g_t = jnp.tanh(g[:, 2 * L:3 * L])
        o_t = jax.nn.sigmoid(g[:, 3 * L:4 * L])
        c_new = f_t * c0 + i_t * g_t
        h_new = o_t * jnp.tanh(c_new)

        hb = h_new.astype(bf16)
        p = jax.nn.relu(dot(hb, wp1) + b[2:3, 0:H])
        p = jax.nn.relu(dot(p.astype(bf16), wp2) + b[3:4, 0:Hh])
        logits = dot(p.astype(bf16), wp3) + b[4:5, 0:A]
        v = jax.nn.relu(dot(hb, wv1) + b[2:3, H:2 * H])
        v = jax.nn.relu(dot(v.astype(bf16), wv2) + b[3:4, Hh:2 * Hh])
        value = dot(v.astype(bf16), wv3) + b[4:5, A:A + 1]
        bl = jax.nn.relu(dot(hb, wb1) + b[2:3, 2 * H:2 * H + Hh])
        bluff = jax.nn.sigmoid(dot(bl.astype(bf16), wb2) + b[4:5, A + 1:A + 2])
        return logits, value, bluff, (h_new.reshape(1, B, L), c_new.reshape(1, B, L))

    return types.SimpleNamespace(init_params=init_params, forward=forward,
                                 rollout=rollout, reference_forward=reference_forward,
                                 meta=meta)


if __name__ == "__main__":
    BATCH = 2
    OBS_SIZE = 32
    ACTION_SIZE = 16
    HIDDEN_SIZE = 64
    LSTM_SIZE = 32
    T_ROLLOUT = 8

    net = make_coup_policy(OBS_SIZE, ACTION_SIZE, HIDDEN_SIZE, LSTM_SIZE)
    m = net.meta

    key = jax.random.PRNGKey(0)
    k_params, k_x, k_x2, k_xs, k_xs2 = jax.random.split(key, 5)
    params = net.init_params(k_params)
    x = jax.random.normal(k_x, (BATCH, OBS_SIZE), jnp.float32)

    tol = dict(rtol=1e-3, atol=1e-3)

    # ---- single step, fresh (zero) hidden state ----
    logits, value, bluff, hidden = net.forward(params, x)
    jax.block_until_ready((logits, value, bluff, hidden))
    r_logits, r_value, r_bluff, r_hidden = net.reference_forward(params, x, None)
    np.testing.assert_allclose(np.asarray(logits), np.asarray(r_logits), **tol)
    np.testing.assert_allclose(np.asarray(value), np.asarray(r_value), **tol)
    np.testing.assert_allclose(np.asarray(bluff), np.asarray(r_bluff), **tol)
    np.testing.assert_allclose(np.asarray(hidden[0]), np.asarray(r_hidden[0]), **tol)
    np.testing.assert_allclose(np.asarray(hidden[1]), np.asarray(r_hidden[1]), **tol)

    # ---- single step, feeding the recurrent state back in ----
    x2 = jax.random.normal(k_x2, (BATCH, OBS_SIZE), jnp.float32)
    l2, v2, b2, hid2 = net.forward(params, x2, hidden)
    jax.block_until_ready((l2, v2, b2, hid2))
    rl2, rv2, rb2, rhid2 = net.reference_forward(params, x2, hidden)
    np.testing.assert_allclose(np.asarray(l2), np.asarray(rl2), **tol)
    np.testing.assert_allclose(np.asarray(v2), np.asarray(rv2), **tol)
    np.testing.assert_allclose(np.asarray(b2), np.asarray(rb2), **tol)
    np.testing.assert_allclose(np.asarray(hid2[0]), np.asarray(rhid2[0]), **tol)
    np.testing.assert_allclose(np.asarray(hid2[1]), np.asarray(rhid2[1]), **tol)

    # ---- T-step rollout (weights DMA'd once, in-kernel loop carrying h/c) ----
    xs = jax.random.normal(k_xs, (T_ROLLOUT, BATCH, OBS_SIZE), jnp.float32)
    ro_logits, ro_values, ro_bluffs, state_slab = net.rollout(params, xs)
    jax.block_until_ready((ro_logits, ro_values, ro_bluffs, state_slab))
    ref_h = None
    for t in range(T_ROLLOUT):
        rl, rv, rb, ref_h = net.reference_forward(params, xs[t], ref_h)
        np.testing.assert_allclose(np.asarray(ro_logits[t]), np.asarray(rl), **tol)
        np.testing.assert_allclose(np.asarray(ro_values[t]), np.asarray(rv), **tol)
        np.testing.assert_allclose(np.asarray(ro_bluffs[t]), np.asarray(rb), **tol)
    np.testing.assert_allclose(np.asarray(state_slab[:BATCH, m.hoff:m.coff]),
                               np.asarray(ref_h[0][0]), **tol)
    np.testing.assert_allclose(np.asarray(state_slab[:BATCH, m.coff:m.used]),
                               np.asarray(ref_h[1][0]), **tol)

    # ---- chain a second rollout off the packed state slab (no wrapper re-packing) ----
    xs2 = jax.random.normal(k_xs2, (2, BATCH, OBS_SIZE), jnp.float32)
    c_logits, c_values, c_bluffs, state_slab2 = net.rollout(params, xs2, state_slab)
    jax.block_until_ready(state_slab2)
    for t in range(2):
        rl, rv, rb, ref_h = net.reference_forward(params, xs2[t], ref_h)
        np.testing.assert_allclose(np.asarray(c_logits[t]), np.asarray(rl), **tol)
        np.testing.assert_allclose(np.asarray(c_values[t]), np.asarray(rv), **tol)
        np.testing.assert_allclose(np.asarray(c_bluffs[t]), np.asarray(rb), **tol)

    assert logits.shape == (BATCH, ACTION_SIZE)
    assert value.shape == (BATCH, 1)
    assert bluff.shape == (BATCH, 1)
    assert hidden[0].shape == (1, BATCH, LSTM_SIZE)
    assert hidden[1].shape == (1, BATCH, LSTM_SIZE)
    assert ro_logits.shape == (T_ROLLOUT, BATCH, ACTION_SIZE)

    print("KERNEL_OK")
</pallas_src>

<mosaic_0001>
module attributes {stable_mosaic.version = 11 : i64} {
  func.func @_kernel(%arg0: memref<1x8x128xbf16, #tpu.memory_space<vmem>>, %arg1: memref<8x128xf32, #tpu.memory_space<vmem>>, %arg2: memref<704x256xbf16, #tpu.memory_space<vmem>>, %arg3: memref<8x256xf32, #tpu.memory_space<vmem>>, %arg4: memref<1x8x128xf32, #tpu.memory_space<vmem>>, %arg5: memref<8x32xf32, #tpu.memory_space<vmem>>, %arg6: memref<8x32xf32, #tpu.memory_space<vmem>>) attributes {dimension_semantics = [], scalar_prefetch = 0 : i64, scratch_operands = 2 : i64, tpu.core_type = #tpu.core_type<tc>} {
    %c0 = arith.constant 0 : index
    %c18 = arith.constant 18 : index
    %0 = vector.load %arg1[%c0, %c18] : memref<8x128xf32, #tpu.memory_space<vmem>>, vector<8x32xf32>
    %c0_0 = arith.constant 0 : index
    %c0_1 = arith.constant 0 : index
    %1 = vector.load %arg5[%c0_0, %c0_1] : memref<8x32xf32, #tpu.memory_space<vmem>>, vector<8x32xf32>
    tpu.vector_store %arg5[%c0_0, %c0_1], %0 {strides = array<i32>} : memref<8x32xf32, #tpu.memory_space<vmem>>, vector<8x32xf32>,
    %c0_2 = arith.constant 0 : index
    %c50 = arith.constant 50 : index
    %2 = vector.load %arg1[%c0_2, %c50] : memref<8x128xf32, #tpu.memory_space<vmem>>, vector<8x32xf32>
    %c0_3 = arith.constant 0 : index
    %c0_4 = arith.constant 0 : index
    %3 = vector.load %arg6[%c0_3, %c0_4] : memref<8x32xf32, #tpu.memory_space<vmem>>, vector<8x32xf32>
    tpu.vector_store %arg6[%c0_3, %c0_4], %2 {strides = array<i32>} : memref<8x32xf32, #tpu.memory_space<vmem>>, vector<8x32xf32>,
    %cst = arith.constant 0.000000e+00 : f32
    %4 = vector.broadcast %cst : f32 to vector<8x46xf32>
    %c0_i32 = arith.constant 0 : i32
    %c1_i32 = arith.constant 1 : i32
    %5 = arith.muli %c0_i32, %c1_i32 : i32
    %c0_i32_5 = arith.constant 0 : i32
    %6 = arith.addi %c0_i32_5, %5 : i32
    %7 = arith.index_cast %6 : i32 to index
    %c0_6 = arith.constant 0 : index
    %c0_7 = arith.constant 0 : index
    %8 = vector.load %arg0[%7, %c0_6, %c0_7] : memref<1x8x128xbf16, #tpu.memory_space<vmem>>, vector<1x8x128xbf16>
    %9 = vector.shape_cast %8 : vector<1x8x128xbf16> to vector<8x128xbf16>
    %c0_8 = arith.constant 0 : index
    %c0_9 = arith.constant 0 : index
    %10 = vector.load %arg2[%c0_8, %c0_9] : memref<704x256xbf16, #tpu.memory_space<vmem>>, vector<128x128xbf16>
    %cst_10 = arith.constant dense<0.000000e+00> : vector<8x128xf32>
    %11 = tpu.matmul %9, %10, %cst_10 {dimension_numbers = #tpu.dot_dimension_numbers<[1], [0], [0], [1], [0, 0, 1, 1], [], []>} : vector<8x128xbf16>, vector<128x128xbf16>, vector<8x128xf32> -> vector<8x128xf32>
    %c0_11 = arith.constant 0 : index
    %c0_12 = arith.constant 0 : index
    %12 = vector.load %arg3[%c0_11, %c0_12] : memref<8x256xf32, #tpu.memory_space<vmem>>, vector<1x128xf32>
    %13 = vector.broadcast %12 : vector<1x128xf32> to vector<8x128xf32>
    %14 = arith.addf %11, %13 : vector<8x128xf32>
    %cst_13 = arith.constant 0.000000e+00 : f32
    %15 = vector.broadcast %cst_13 : f32 to vector<8x128xf32>
    %16 = arith.maximumf %14, %15 : vector<8x128xf32>
    %17 = arith.truncf %16 : vector<8x128xf32> to vector<8x128xbf16>
    %c0_14 = arith.constant 0 : index
    %c0_15 = arith.constant 0 : index
    %18 = vector.load %arg5[%c0_14, %c0_15] : memref<8x32xf32, #tpu.memory_space<vmem>>, vector<8x32xf32>
    %19 = arith.truncf %18 : vector<8x32xf32> to vector<8x32xbf16>
    %20 = tpu.concatenate %17, %19 in 1 : vector<8x128xbf16>, vector<8x32xbf16> -> vector<8x160xbf16>
    %c128 = arith.constant 128 : index
    %c0_16 = arith.constant 0 : index
    %21 = vector.load %arg2[%c128, %c0_16] : memref<704x256xbf16, #tpu.memory_space<vmem>>, vector<160x128xbf16>
    %cst_17 = arith.constant dense<0.000000e+00> : vector<8x128xf32>
    %22 = tpu.matmul %20, %21, %cst_17 {dimension_numbers = #tpu.dot_dimension_numbers<[1], [0], [0], [1], [0, 0, 1, 1], [], []>} : vector<8x160xbf16>, vector<160x128xbf16>, vector<8x128xf32> -> vector<8x128xf32>
    %c1 = arith.constant 1 : index
    %c0_18 = arith.constant 0 : index
    %23 = vector.load %arg3[%c1, %c0_18] : memref<8x256xf32, #tpu.memory_space<vmem>>, vector<1x128xf32>
    %24 = vector.broadcast %23 : vector<1x128xf32> to vector<8x128xf32>
    %25 = arith.addf %22, %24 : vector<8x128xf32>
    %26 = arith.negf %25 : vector<8x128xf32>
    %27 = math.exp %26 : vector<8x128xf32>
    %cst_19 = arith.constant 1.000000e+00 : f32
    %28 = vector.broadcast %cst_19 : f32 to vector<8x128xf32>
    %29 = arith.addf %28, %27 : vector<8x128xf32>
    %30 = arith.divf %28, %29 : vector<8x128xf32>
    %31 = math.tanh %25 : vector<8x128xf32>
    %32 = vector.extract_strided_slice %30 {offsets = [0, 0], sizes = [8, 32], strides = [1, 1]} : vector<8x128xf32> to vector<8x32xf32>
    %33 = vector.extract_strided_slice %30 {offsets = [0, 32], sizes = [8, 32], strides = [1, 1]} : vector<8x128xf32> to vector<8x32xf32>
    %34 = vector.extract_strided_slice %30 {offsets = [0, 96], sizes = [8, 32], strides = [1, 1]} : vector<8x128xf32> to vector<8x32xf32>
    %35 = vector.extract_strided_slice %31 {offsets = [0, 64], sizes = [8, 32], strides = [1, 1]} : vector<8x128xf32> to vector<8x32xf32>
    %c0_20 = arith.constant 0 : index
    %c0_21 = arith.constant 0 : index
    %36 = vector.load %arg6[%c0_20, %c0_21] : memref<8x32xf32, #tpu.memory_space<vmem>>, vector<8x32xf32>
    %37 = arith.mulf %33, %36 : vector<8x32xf32>
    %38 = arith.mulf %32, %35 : vector<8x32xf32>
    %39 = arith.addf %37, %38 : vector<8x32xf32>
    %40 = math.tanh %39 : vector<8x32xf32>
    %41 = arith.mulf %34, %40 : vector<8x32xf32>
    %42 = arith.truncf %41 : vector<8x32xf32> to vector<8x32xbf16>
    %c288 = arith.constant 288 : index
    %c0_22 = arith.constant 0 : index
    %43 = vector.load %arg2[%c288, %c0_22] : memref<704x256xbf16, #tpu.memory_space<vmem>>, vector<32x256xbf16>
    %cst_23 = arith.constant dense<0.000000e+00> : vector<8x256xf32>
    %44 = tpu.matmul %42, %43, %cst_23 {dimension_numbers = #tpu.dot_dimension_numbers<[1], [0], [0], [1], [0, 0, 1, 1], [], []>} : vector<8x32xbf16>, vector<32x256xbf16>, vector<8x256xf32> -> vector<8x256xf32>
    %c2 = arith.constant 2 : index
    %c0_24 = arith.constant 0 : index
    %45 = vector.load %arg3[%c2, %c0_24] : memref<8x256xf32, #tpu.memory_space<vmem>>, vector<1x256xf32>
    %46 = vector.broadcast %45 : vector<1x256xf32> to vector<8x256xf32>
    %47 = arith.addf %44, %46 : vector<8x256xf32>
    %cst_25 = arith.constant 0.000000e+00 : f32
    %48 = vector.broadcast %cst_25 : f32 to vector<8x256xf32>
    %49 = arith.maximumf %47, %48 : vector<8x256xf32>
    %50 = arith.truncf %49 : vector<8x256xf32> to vector<8x256xbf16>
    %c320 = arith.constant 320 : index
    %c0_26 = arith.constant 0 : index
    %51 = vector.load %arg2[%c320, %c0_26] : memref<704x256xbf16, #tpu.memory_space<vmem>>, vector<256x128xbf16>
    %cst_27 = arith.constant dense<0.000000e+00> : vector<8x128xf32>
    %52 = tpu.matmul %50, %51, %cst_27 {dimension_numbers = #tpu.dot_dimension_numbers<[1], [0], [0], [1], [0, 0, 1, 1], [], []>} : vector<8x256xbf16>, vector<256x128xbf16>, vector<8x128xf32> -> vector<8x128xf32>
    %c3 = arith.constant 3 : index
    %c0_28 = arith.constant 0 : index
    %53 = vector.load %arg3[%c3, %c0_28] : memref<8x256xf32, #tpu.memory_space<vmem>>, vector<1x128xf32>
    %54 = vector.broadcast %53 : vector<1x128xf32> to vector<8x128xf32>
    %55 = arith.addf %52, %54 : vector<8x128xf32>
    %cst_29 = arith.constant 0.000000e+00 : f32
    %56 = vector.broadcast %cst_29 : f32 to vector<8x128xf32>
    %57 = arith.maximumf %55, %56 : vector<8x128xf32>
    %58 = arith.truncf %57 : vector<8x128xf32> to vector<8x128xbf16>
    %c576 = arith.constant 576 : index
    %c0_30 = arith.constant 0 : index
    %59 = vector.load %arg2[%c576, %c0_30] : memref<704x256xbf16, #tpu.memory_space<vmem>>, vector<128x128xbf16>
    %cst_31 = arith.constant dense<0.000000e+00> : vector<8x128xf32>
    %60 = tpu.matmul %58, %59, %cst_31 {dimension_numbers = #tpu.dot_dimension_numbers<[1], [0], [0], [1], [0, 0, 1, 1], [], []>} : vector<8x128xbf16>, vector<128x128xbf16>, vector<8x128xf32> -> vector<8x128xf32>
    %c4 = arith.constant 4 : index
    %c0_32 = arith.constant 0 : index
    %61 = vector.load %arg3[%c4, %c0_32] : memref<8x256xf32, #tpu.memory_space<vmem>>, vector<1x128xf32>
    %62 = vector.broadcast %61 : vector<1x128xf32> to vector<8x128xf32>
    %63 = arith.addf %60, %62 : vector<8x128xf32>
    %64 = vector.extract_strided_slice %63 {offsets = [0, 0], sizes = [8, 17], strides = [1, 1]} : vector<8x128xf32> to vector<8x17xf32>
    %65 = vector.extract_strided_slice %63 {offsets = [0, 17], sizes = [8, 1], strides = [1, 1]} : vector<8x128xf32> to vector<8x1xf32>
    %66 = arith.negf %65 : vector<8x1xf32>
    %67 = math.exp %66 : vector<8x1xf32>
    %cst_33 = arith.constant 1.000000e+00 : f32
    %68 = vector.broadcast %cst_33 : f32 to vector<8x1xf32>
    %69 = arith.addf %68, %67 : vector<8x1xf32>
    %70 = arith.divf %68, %69 : vector<8x1xf32>
    %71 = tpu.concatenate %64, %70, %41, %39, %4 in 1 : vector<8x17xf32>, vector<8x1xf32>, vector<8x32xf32>, vector<8x32xf32>, vector<8x46xf32> -> vector<8x128xf32>
    %72 = arith.index_cast %6 : i32 to index
    %c0_34 = arith.constant 0 : index
    %c0_35 = arith.constant 0 : index
    %73 = vector.load %arg4[%72, %c0_34, %c0_35] : memref<1x8x128xf32, #tpu.memory_space<vmem>>, vector<1x8x128xf32>
    %74 = vector.shape_cast %73 : vector<1x8x128xf32> to vector<8x128xf32>
    %75 = vector.shape_cast %71 : vector<8x128xf32> to vector<1x8x128xf32>
    tpu.vector_store %arg4[%72, %c0_34, %c0_35], %75 {strides = array<i32>} : memref<1x8x128xf32, #tpu.memory_space<vmem>>, vector<1x8x128xf32>,
    %c0_36 = arith.constant 0 : index
    %c0_37 = arith.constant 0 : index
    %76 = vector.load %arg5[%c0_36, %c0_37] : memref<8x32xf32, #tpu.memory_space<vmem>>, vector<8x32xf32>
    tpu.vector_store %arg5[%c0_36, %c0_37], %41 {strides = array<i32>} : memref<8x32xf32, #tpu.memory_space<vmem>>, vector<8x32xf32>,
    %c0_38 = arith.constant 0 : index
    %c0_39 = arith.constant 0 : index
    %77 = vector.load %arg6[%c0_38, %c0_39] : memref<8x32xf32, #tpu.memory_space<vmem>>, vector<8x32xf32>
    tpu.vector_store %arg6[%c0_38, %c0_39], %39 {strides = array<i32>} : memref<8x32xf32, #tpu.memory_space<vmem>>, vector<8x32xf32>,
    %c1_i32_40 = arith.constant 1 : i32
    return
  }
}

</mosaic_0001>

<bundles_post_ra>
// kernel: forward.1
= control target key start
LH: loop header
LB: loop body
LE: loop exit
PB: predicated region body
PF: predicated region fallthrough
CT: control target
= control target key end

     0   :  { %9 = vsyncpa [#allocation5], 0  ;;  %s937_s15 = smov [#allocation4]   ;;  %s1047_s0 = inlined_call_operand.vmem [shape: bf16[1,8,128], index: 0, kind: input, shape index: {}]   ;;  %s1048_s1 = inlined_call_operand.vmem [shape: f32[8,128], index: 1, kind: input, shape index: {}]   ;;  %s1049_s2 = inlined_call_operand.hbm [shape: bf16[704,256], index: 2, kind: input, shape index: {}]   ;;  %s1050_s3 = inlined_call_operand.vmem [shape: f32[8,256], index: 3, kind: input, shape index: {}]   ;;  %s1051_s4 = inlined_call_operand.vmem [shape: f32[1,8,128], index: 4, kind: output, shape index: {}]  }
   0x1   :  { %s19_s16 = sshll.u32 %s937_s15, 4  ;;  %s913_s19 = scalar_lea.hbm %s1049_s2, 11264  ;;  %s20_s16 = int_to_ptr.vmem [resolvable:$true] %s19_s16 }
   0x2   :  { %p914_p0 = scmp.ne.s32.totalorder %s1049_s2, %s913_s19  ;;  %p917_p1 = scmp.lt.u32.totalorder %s913_s19, %s1049_s2 }
   0x4   :  { %p919_p2 = pnand %p917_p1, %p914_p0 }
   0x6   :  { %922 = shalt.err (!%p919_p2)
}
   0x7   :  { %s923_s24 = scalar_lea.vmem %s20_s16, 11264  ;;  %p928_p4 = scmp.lt.s32.totalorder %s20_s16, %s20_s16 }
   0x8   :  { %p924_p3 = scmp.ne.s32.totalorder %s20_s16, %s923_s24  ;;  %p929_p5 = scmp.lt.s32.totalorder %s923_s24, %s923_s24 }
   0xa   :  { %p930_p6 = por %p929_p5, %p928_p4 }
   0xc   :  { %p931_p7 = pnand %p930_p6, %p924_p3 }
   0xe   :  { %934 = shalt.err (!%p931_p7)
}
   0xf   :  { %s938_s25 = smov 128   ;;  %s939_s26 = smov 8  }
  0x10   :  { %25 = dma.hbm_to_vmem [thread:$0]  %s1049_s2, 11264, %s20_s16, [#allocation5], %s938_s25, %s938_s25, %s939_s26  }
  0x11   :  { %935 = dma.done.wait [#allocation5], 11264  }
  0x12   :  { %936 = vsyncadd [#allocation5], 4294956032  ;;  %v940_v0 = vmov 0.0   ;;  %vm941_vm0 = vmmov 0   ;;  %v942_v1 = vmov 0   ;;  %v32_v5 = vld [vmem:[%s1048_s1] sm:$0xff] }
  0x13   :  { %800 = vmatprep.subr.bf16.mxu0 %v940_v0  ;;  %816 = vmatprep.mubr.msk.bf16.mxu0 %vm941_vm0, %v940_v0  ;;  %v853_v2 = vld [vmem:[#allocation4] ss:$8 sps:$4 sm:$0xff]   ;;  %v854_v3 = vld [vmem:[#allocation4 + $0x10] ss:$8 sps:$4 sm:$0xff]   ;;  %s943_s30 = smov 110   ;;  %vm37_vm1 = vcmask 261120  }
  0x14   :  { %239 = vmatprep.subr.bf16.mxu1 %v942_v1  ;;  %801 = vmatpush3.bf16.msra.mxu0 %v853_v2  ;;  %v855_v4 = vld [vmem:[#allocation4 + $0x20] ss:$8 sps:$4 sm:$0xff]   ;;  %v856_v7 = vld [vmem:[#allocation4 + $0x30] ss:$8 sps:$4 sm:$0xff]   ;;  %s945_s10 = smov 64   ;;  %s946_s11 = smov 32  }
  0x15   :  { %802 = vmatprep.subr.bf16.mxu0 %v940_v0  ;;  %34 = vrot.lane.b32.xlu0 %v32_v5, %s943_s30  ;;  %v861_v6 = vld [vmem:[#allocation4 + $0x80] ss:$8 sps:$4 sm:$0xff]   ;;  %v862_v8 = vld [vmem:[#allocation4 + $0x90] ss:$8 sps:$4 sm:$0xff]   ;;  %v873_v54 = vld [vmem:[#allocation4 + $0x124] ss:$8 sps:$4 sm:$0xff]  }
  0x16   :  { %240 = vmatpush1.bf16.msra.mxu1 %v861_v6  ;;  %v857_v9 = vld [vmem:[#allocation4 + $0x40] ss:$8 sps:$4 sm:$0xff]   ;;  %v858_v11 = vld [vmem:[#allocation4 + $0x50] ss:$8 sps:$4 sm:$0xff]   ;;  %v876_v55 = vld [vmem:[#allocation4 + $0x134] ss:$8 sps:$4 sm:$0xff]  }
  0x17   :  { %241 = vmatprep.subr.bf16.mxu1 %v942_v1  ;;  %v863_v10 = vld [vmem:[#allocation4 + $0xa0] ss:$8 sps:$4 sm:$0xff]   ;;  %v864_v12 = vld [vmem:[#allocation4 + $0xb0] ss:$8 sps:$4 sm:$0xff]   ;;  %s947_s12 = smov 50   ;;  %s948_s13 = smov 18  }
  0x18   :  { %803 = vmatpush3.bf16.msra.mxu0 %v854_v3  ;;  %v859_v13 = vld [vmem:[#allocation4 + $0x60] ss:$8 sps:$4 sm:$0xff]   ;;  %v860_v15 = vld [vmem:[#allocation4 + $0x70] ss:$8 sps:$4 sm:$0xff]   ;;  %s949_s14 = smov 96   ;;  %vm687_vm2 = vcmask 138240  }
  0x19   :  { %804 = vmatprep.subr.bf16.mxu0 %v940_v0  ;;  %v865_v14 = vld [vmem:[#allocation4 + $0xc0] ss:$8 sps:$4 sm:$0xff]   ;;  %v866_v16 = vld [vmem:[#allocation4 + $0xd0] ss:$8 sps:$4 sm:$0xff]   ;;  %vm689_vm3 = vcmask 146432   ;;  %vm691_vm4 = vcmask 408576  }
  0x1a   :  { %242 = vmatpush1.bf16.msra.mxu1 %v862_v8  ;;  %v45_v17 = vld [vmem:[%s1047_s0] sm:$0xf]  ;;  %v867_v18 = vld [vmem:[#allocation4 + $0xe0] ss:$8 sps:$4 sm:$0xff]   ;;  %s944_s0 = smov 78   ;;  %vm693_vm5 = vcmask 670720  }
  0x1b   :  { %243 = vmatprep.subr.bf16.mxu1 %v942_v1  ;;  %v868_v19 = vld [vmem:[#allocation4 + $0xf0] ss:$8 sps:$4 sm:$0xff]   ;;  %v869_v20 = vld [vmem:[#allocation4 + $0x100] ss:$8 sps:$4 sm:$0xff]   ;;  %41 = vrot.lane.b32.xlu0 %v32_v5, %s944_s0 }
  0x1c   :  { %805 = vmatpush3.bf16.msra.mxu0 %v855_v4  ;;  %v870_v21 = vld [vmem:[#allocation4 + $0x110] ss:$8 sps:$4 sm:$0xff]   ;;  %v871_v53 = vld [vmem:[#allocation4 + $0x120] ss:$8 sps:$4 sm:$0xff]  }
  0x1d   :  { %806 = vmatprep.subr.bf16.mxu0 %v940_v0  ;;  %v62_v25 = vld [vmem:[%s1050_s3] ss:$0 sm:$0xff]  ;;  %v175_v34 = vld [vmem:[%s1050_s3 + $0x1] ss:$0 sm:$0xff]  ;;  %v877_v58 = vld [vmem:[#allocation4 + $0x1c0] ss:$8 sps:$4 sm:$0xff]  }
  0x1e   :  { %244 = vmatpush1.bf16.msra.mxu1 %v863_v10  ;;  %v874_v56 = vld [vmem:[#allocation4 + $0x130] ss:$8 sps:$4 sm:$0xff]   ;;  %v878_v62 = vld [vmem:[#allocation4 + $0x140] ss:$8 sps:$4 sm:$0xff]  }
  0x1f   :  { %245 = vmatprep.subr.bf16.mxu1 %v942_v1  ;;  %v879_v63 = vld [vmem:[#allocation4 + $0x1d0] ss:$8 sps:$4 sm:$0xff]   ;;  %v881_v4 = vld [vmem:[#allocation4 + $0x1e0] ss:$8 sps:$4 sm:$0xff]  }
  0x20   :  { %807 = vmatpush3.bf16.msra.mxu0 %v856_v7  ;;  %v880_v3 = vld [vmem:[#allocation4 + $0x150] ss:$8 sps:$4 sm:$0xff]   ;;  %v882_v6 = vld [vmem:[#allocation4 + $0x160] ss:$8 sps:$4 sm:$0xff]  }
  0x21   :  { %808 = vmatprep.subr.bf16.mxu0 %v940_v0  ;;  %v883_v7 = vld [vmem:[#allocation4 + $0x1f0] ss:$8 sps:$4 sm:$0xff]   ;;  %v885_v10 = vld [vmem:[#allocation4 + $0x200] ss:$8 sps:$4 sm:$0xff]  }
  0x22   :  { %246 = vmatpush1.bf16.msra.mxu1 %v864_v12  ;;  %v887_v12 = vld [vmem:[#allocation4 + $0x210] ss:$8 sps:$4 sm:$0xff]  }
  0x23   :  { %247 = vmatprep.subr.bf16.mxu1 %v942_v1 }
  0x24   :  { %809 = vmatpush3.bf16.msra.mxu0 %v857_v9  ;;  %v884_v9 = vld [vmem:[#allocation4 + $0x170] ss:$8 sps:$4 sm:$0xff]  }
  0x25   :  { %810 = vmatprep.subr.bf16.mxu0 %v940_v0 }
  0x26   :  { %248 = vmatpush1.bf16.msra.mxu1 %v865_v14  ;;  %v889_v14 = vld [vmem:[#allocation4 + $0x220] ss:$8 sps:$4 sm:$0xff]  }
  0x27   :  { %249 = vmatprep.subr.bf16.mxu1 %v942_v1 }
  0x28   :  { %811 = vmatpush3.bf16.msra.mxu0 %v858_v11  ;;  %v886_v11 = vld [vmem:[#allocation4 + $0x180] ss:$8 sps:$4 sm:$0xff]  }
  0x29   :  { %812 = vmatprep.subr.bf16.mxu0 %v940_v0 }
  0x2a   :  { %250 = vmatpush1.bf16.msra.mxu1 %v866_v16  ;;  %v891_v16 = vld [vmem:[#allocation4 + $0x230] ss:$8 sps:$4 sm:$0xff]  }
  0x2b   :  { %251 = vmatprep.subr.bf16.mxu1 %v942_v1 }
  0x2c   :  { %813 = vmatpush3.bf16.msra.mxu0 %v859_v13  ;;  %v888_v13 = vld [vmem:[#allocation4 + $0x190] ss:$8 sps:$4 sm:$0xff]  }
  0x2d   :  { %814 = vmatprep.subr.bf16.mxu0 %v940_v0 }
  0x2e   :  { %252 = vmatpush1.bf16.msra.mxu1 %v867_v18  ;;  %v893_v18 = vld [vmem:[#allocation4 + $0x240] ss:$8 sps:$4 sm:$0xff]  }
  0x2f   :  { %253 = vmatprep.subr.bf16.mxu1 %v942_v1 }
  0x30   :  { %815 = vmatpush3.bf16.msra.mxu0 %v860_v15  ;;  %v890_v15 = vld [vmem:[#allocation4 + $0x1a0] ss:$8 sps:$4 sm:$0xff]  }
  0x31   :  { %352 = vmatprep.subr.bf16.mxu0 %v873_v54 }
  0x32   :  { %254 = vmatpush1.bf16.msra.mxu1 %v868_v19  ;;  %v894_v19 = vld [vmem:[#allocation4 + $0x250] ss:$8 sps:$4 sm:$0xff]  }
  0x33   :  { %817 = vmatmul.mubr.bf16.vlgmr.msra.gmra.mrb[0].mxu0 %v45_v17  ;;  %255 = vmatprep.subr.bf16.mxu1 %v942_v1  ;;  %v892_v17 = vld [vmem:[#allocation4 + $0x1b0] ss:$8 sps:$4 sm:$0xff]  }
  0x34   :  { %384 = vmatprep.mubr.bf16.mxu0 %v942_v1  ;;  %353 = vmatpush1.bf16.msra.mxu0 %v871_v53 }
  0x35   :  { %354 = vmatprep.subr.bf16.mxu0 %v876_v55 }
  0x36   :  { %256 = vmatpush1.bf16.msra.mxu1 %v869_v20  ;;  %v895_v20 = vld [vmem:[#allocation4 + $0x260] ss:$8 sps:$4 sm:$0xff]  }
  0x37   :  { %257 = vmatprep.subr.bf16.mxu1 %v942_v1 }
  0x38   :  { %355 = vmatpush1.bf16.msra.mxu0 %v874_v56 }
  0x39   :  { %769 = vmatprep.subr.bf16.mxu0 %v877_v58 }
  0x3a   :  { %258 = vmatpush1.bf16.msra.mxu1 %v870_v21  ;;  %v896_v21 = vld [vmem:[#allocation4 + $0x270] ss:$8 sps:$4 sm:$0xff]  }
  0x3b   :  { %820 = vmatprep.subr.bf16.mxu1 %v940_v0 }
  0x87   :  { %v35_v22 = vpop.permute.xlu0 %34 }
  0x88   :  { %38 = vst.msk [vmem:[#allocation2] sm:$0xff] %vm37_vm1, %v35_v22  ;;  %v897_v22 = vld [vmem:[#allocation4 + $0x280] ss:$8 sps:$4 sm:$0xff]  }
  0x8d   :  { %v42_v33 = vpop.permute.xlu0 %41 }
  0x8e   :  { %44 = vst.msk [vmem:[#allocation3] sm:$0xff] %vm37_vm1, %v42_v33 }
  0x8f   :  { %v153_v23 = vld [vmem:[#allocation2] sm:$0xff] }
  0x90   :  { %v154_v24 = vpack.c.bf16 %v153_v23, %v153_v23  ;;  %v898_v23 = vld [vmem:[#allocation4 + $0x290] ss:$8 sps:$4 sm:$0xff]  }
  0x92   :  { %727 = vmatprep.mubr.msk.bf16.mxu1 %vm37_vm1, %v154_v24  ;;  %v316_v24 = vlaneseq }
  0x95   :  { %v286_v41 = vld [vmem:[#allocation3] sm:$0xff] }
 0x106   :  { %v145_v26 = vpop.f32.mrb[0].mxu0 }
 0x107   :  { %v146_v27 = vadd.f32 %v145_v26, %v62_v25  ;;  %v818_v28 = vpop.f32.mrb[1].mxu0  ;;  %v317_v25 = vshrl.u32 %v316_v24, 7 }
 0x108   :  { %v148_v29 = vpop.f32.mrb[2].mxu0 }
 0x109   :  { %v151_v30 = vmax.f32 %v146_v27, 0.0  ;;  %v819_v31 = vpop.f32.mrb[3].mxu0  ;;  %v318_v26 = vsub.s32 0, %v317_v25  ;;  %v729_v27 = vld [vmem:[%s1050_s3 + $0x2] ss:$8 sm:$0x3] }
 0x10a   :  { %v322_v28 = vsub.s32 1, %v317_v25 }
 0x10b   :  { %v152_v32 = vpack.c.bf16 %v151_v30, %v151_v30  ;;  %v319_v29 = vrot.slane %v729_v27, %v318_v26 }
 0x10c   :  { %v323_v30 = vrot.slane %v729_v27, %v322_v28 }
 0x10d   :  { %272 = vmatmul.mubr.bf16.vlgmr.msra.gmra.mrb[0].mxu1 %v152_v32 }
 0x10e   :  { %836 = vmatprep.mubr.msk.bf16.mxu1 %vm941_vm0, %v940_v0  ;;  %821 = vmatpush3.bf16.msra.mxu1 %v893_v18 }
 0x10f   :  { %822 = vmatprep.subr.bf16.mxu1 %v940_v0 }
 0x112   :  { %823 = vmatpush3.bf16.msra.mxu1 %v894_v19 }
 0x113   :  { %824 = vmatprep.subr.bf16.mxu1 %v940_v0 }
 0x116   :  { %825 = vmatpush3.bf16.msra.mxu1 %v895_v20 }
 0x117   :  { %826 = vmatprep.subr.bf16.mxu1 %v940_v0 }
 0x11a   :  { %827 = vmatpush3.bf16.msra.mxu1 %v896_v21 }
 0x11b   :  { %828 = vmatprep.subr.bf16.mxu1 %v940_v0 }
 0x11e   :  { %829 = vmatpush3.bf16.msra.mxu1 %v897_v22 }
 0x11f   :  { %830 = vmatprep.subr.bf16.mxu1 %v940_v0 }
 0x122   :  { %831 = vmatpush3.bf16.msra.mxu1 %v898_v23 }
 0x123   :  { %832 = vmatprep.subr.bf16.mxu1 %v940_v0 }
 0x1e0   :  { %v273_v35 = vpop.f32.mrb[0].mxu1 }
 0x1e1   :  { %v274_v36 = vadd.f32 %v273_v35, %v175_v34  ;;  %v275_v37 = vpop.f32.mrb[1].mxu1 }
 0x1e2   :  { %v276_v38 = vpop.f32.mrb[2].mxu1 }
 0x1e3   :  { %901 = vtanh.f32 %v274_v36  ;;  %v277_v39 = vpop.f32.mrb[3].mxu1  ;;  %v728_v42 = vmul.f32 -1.442695, %v274_v36 }
 0x1e5   :  { %903 = vpow2.f32 %v728_v42  ;;  %v900_v42 = vld [vmem:[#allocation4 + $0x2b0] ss:$8 sps:$4 sm:$0xff]  }
 0x1ed   :  { %v902_v40 = vpop.eup %901 }
 0x1ee   :  { %293 = vrot.lane.b32.xlu1 %v902_v40, %s945_s10 }
 0x1ef   :  { %v904_v43 = vpop.eup %903 }
 0x1f0   :  { %v282_v44 = vadd.f32 1.0, %v904_v43 }
 0x1f2   :  { %288 = vrot.lane.b32.xlu1 %v286_v41, %s946_s11  ;;  %905 = vrcp.f32 %v282_v44  ;;  %v899_v41 = vld [vmem:[#allocation4 + $0x2a0] ss:$8 sps:$4 sm:$0xff]   ;;  %v429_v44 = vld [vmem:[%s1050_s3 + $0x3] ss:$0 sm:$0xff] }
 0x1f3   :  { %833 = vmatpush3.bf16.msra.mxu1 %v899_v41 }
 0x1f4   :  { %834 = vmatprep.subr.bf16.mxu1 %v940_v0 }
 0x1f7   :  { %835 = vmatpush3.bf16.msra.mxu1 %v900_v42 }
 0x1fc   :  { %v906_v45 = vpop.eup %905 }
 0x260   :  { %v294_v46 = vpop.permute.xlu1 %293 }
 0x261   :  { %v296_v47 = vmul.f32 %v906_v45, %v294_v46 }
 0x263   :  { %298 = vrot.lane.b32.xlu0 %v296_v47, %s946_s11 }
 0x264   :  { %v289_v48 = vpop.permute.xlu1 %288 }
 0x265   :  { %v291_v49 = vmul.f32 %v906_v45, %v289_v48 }
 0x2d5   :  { %v299_v50 = vpop.permute.xlu0 %298 }
 0x2d6   :  { %v301_v51 = vadd.f32 %v299_v50, %v291_v49 }
 0x2d8   :  { %907 = vtanh.f32 %v301_v51 }
 0x2e2   :  { %v908_v52 = vpop.eup %907 }
 0x2e3   :  { %304 = vrot.lane.b32.xlu1 %v908_v52, %s945_s10  ;;  %v584_v52 = vld [vmem:[%s1050_s3 + $0x4] ss:$0 sm:$0xff] }
 0x355   :  { %v305_v57 = vpop.permute.xlu1 %304 }
 0x356   :  { %v307_v59 = vmul.f32 %v906_v45, %v305_v57 }
 0x358   :  { %680 = vrot.lane.b32.xlu1 %v307_v59, %s947_s12  ;;  %v308_v60 = vpack.c.bf16 %v307_v59, %v307_v59 }
 0x35a   :  { %327 = vrot.lane.b32.xlu0 %v308_v60, %s946_s11 }
 0x35c   :  { %696 = vrot.lane.b32.xlu1 %v307_v59, %s946_s11 }
 0x35e   :  { %684 = vrot.lane.b32.xlu0 %v301_v51, %s948_s13 }
 0x362   :  { %700 = vrot.lane.b32.xlu0 %v301_v51, %s949_s14 }
 0x3ca   :  { %v1019_v61 = vpop.permute.xlu1 %680 }
 0x3cc   :  { %v328_v1 = vpop.permute.xlu0 %327 }
 0x3cd   :  { %734 = vmatmul.mubr.msk.bf16.vlgmr.msra.gmra.mrb[4].mxu0 %vm37_vm1, %v328_v1 }
 0x3ce   :  { %v697_v2 = vpop.permute.xlu1 %696  ;;  %770 = vmatpush3.bf16.msra.mxu0 %v878_v62 }
 0x3cf   :  { %699 = vst.msk [vmem:[#allocation2] sm:$0xff] %vm37_vm1, %v697_v2  ;;  %771 = vmatprep.subr.bf16.mxu0 %v879_v63 }
 0x3d0   :  { %v1023_v5 = vpop.permute.xlu0 %684 }
 0x3d2   :  { %772 = vmatpush3.bf16.msra.mxu0 %v880_v3 }
 0x3d3   :  { %773 = vmatprep.subr.bf16.mxu0 %v881_v4 }
 0x3d4   :  { %v701_v8 = vpop.permute.xlu0 %700 }
 0x3d5   :  { %703 = vst.msk [vmem:[#allocation3] sm:$0xff] %vm37_vm1, %v701_v8 }
 0x3d6   :  { %774 = vmatpush3.bf16.msra.mxu0 %v882_v6 }
 0x3d7   :  { %775 = vmatprep.subr.bf16.mxu0 %v883_v7 }
 0x3da   :  { %776 = vmatpush3.bf16.msra.mxu0 %v884_v9 }
 0x3db   :  { %777 = vmatprep.subr.bf16.mxu0 %v885_v10 }
 0x3de   :  { %778 = vmatpush3.bf16.msra.mxu0 %v886_v11 }
 0x3df   :  { %779 = vmatprep.subr.bf16.mxu0 %v887_v12 }
 0x3e2   :  { %780 = vmatpush3.bf16.msra.mxu0 %v888_v13 }
 0x3e3   :  { %781 = vmatprep.subr.bf16.mxu0 %v889_v14 }
 0x3e6   :  { %782 = vmatpush3.bf16.msra.mxu0 %v890_v15 }
 0x3e7   :  { %783 = vmatprep.subr.bf16.mxu0 %v891_v16 }
 0x3ea   :  { %784 = vmatpush3.bf16.msra.mxu0 %v892_v17 }
 0x4a0   :  { %v386_v31 = vpop.f32.mrb[4].mxu0 }
 0x4a1   :  { %v387_v32 = vadd.f32 %v386_v31, %v319_v29  ;;  %v388_v33 = vpop.f32.mrb[5].mxu0 }
 0x4a2   :  { %v389_v34 = vadd.f32 %v388_v33, %v323_v30  ;;  %v390_v35 = vpop.f32.mrb[6].mxu0 }
 0x4a3   :  { %v393_v36 = vmax.f32 %v387_v32, 0.0  ;;  %v391_v37 = vpop.f32.mrb[7].mxu0 }
 0x4a4   :  { %v394_v38 = vmax.f32 %v389_v34, 0.0 }
 0x4a5   :  { %v395_v40 = vpack.c.bf16 %v393_v36, %v393_v36 }
 0x4a6   :  { %v396_v39 = vpack.c.bf16 %v394_v38, %v394_v38 }
 0x4a8   :  { %558 = vmatprep.mubr.bf16.mxu0 %v396_v39 }
 0x4a9   :  { %559 = vmatmul.mubr.bf16.vlgmr.msra.gmra.mrb[8].mxu0 %v395_v40 }
 0x57c   :  { %v785_v43 = vpop.f32.mrb[8].mxu0 }
 0x57d   :  { %v786_v45 = vpop.f32.mrb[9].mxu0 }
 0x57e   :  { %v787_v46 = vadd.f32 %v786_v45, %v785_v43  ;;  %v788_v47 = vpop.f32.mrb[10].mxu0 }
 0x57f   :  { %v789_v48 = vpop.f32.mrb[11].mxu0 }
 0x580   :  { %v561_v49 = vadd.f32 %v787_v46, %v429_v44 }
 0x582   :  { %v566_v50 = vmax.f32 %v561_v49, 0.0 }
 0x584   :  { %v567_v51 = vpack.c.bf16 %v566_v50, %v566_v50 }
 0x586   :  { %837 = vmatmul.mubr.bf16.vlgmr.msra.gmra.mrb[4].mxu1 %v567_v51 }
 0x659   :  { %v667_v0 = vpop.f32.mrb[4].mxu1 }
 0x65a   :  { %v668_v53 = vadd.f32 %v667_v0, %v584_v52  ;;  %v838_v54 = vpop.f32.mrb[5].mxu1 }
 0x65b   :  { %v670_v55 = vpop.f32.mrb[6].mxu1 }
 0x65c   :  { %v759_v56 = vmul.f32 -1.442695, %v668_v53  ;;  %v839_v57 = vpop.f32.mrb[7].mxu1 }
 0x65e   :  { %909 = vpow2.f32 %v759_v56 }
 0x668   :  { %v910_v58 = vpop.eup %909 }
 0x669   :  { %v676_v59 = vadd.f32 1.0, %v910_v58 }
 0x66b   :  { %911 = vrcp.f32 %v676_v59 }
 0x675   :  { %v912_v60 = vpop.eup %911 }
 0x676   :  { %v688_v62 = vsel %vm687_vm2, %v668_v53, %v912_v60 }
 0x677   :  { %v690_v63 = vsel %vm689_vm3, %v688_v62, %v1019_v61 }
 0x678   :  { %v692_v1 = vsel %vm691_vm4, %v690_v63, %v1023_v5 }
 0x679   :  { %v694_v2 = vsel %vm693_vm5, %v692_v1, 0.0 }
 0x67a   :  { %695 = vst [vmem:[%s1051_s4] sm:$0xff] %v694_v2 }
 0x67b   :  { %708 = vsyncpa [#allocation5], 1 }

</bundles_post_ra>
